<compile_context>
chip_gen: v5e
topology: v5e:2x2
jax: 0.10.0
libtpu: 0.0.40
codegen_flags: <defaults>
</compile_context>

<pallas_src>
import functools

import jax
import jax.numpy as jnp
import numpy as np
from jax.experimental import pallas as pl
from jax.experimental.pallas import tpu as pltpu


def _focus_ibn_silu_kernel(x_ref, w_ref, g_ref, b_ref, m_ref, o_ref, *, eps):
    # x_ref: (1, S, 4*C1)  w_ref: (4*C1, C2)  g/b/m: (1, C2)  o_ref: (1, S, C2)
    x = x_ref[0]                                                      # (S, 4*C1)
    # 1x1 conv == channel matmul; BN scale already folded into the BN columns of w.
    y = jnp.dot(x, w_ref[...], preferred_element_type=jnp.float32)   # (S, C2)

    # Instance-norm statistics over the spatial axis (computed for all channels,
    # branch-free; the BN half is discarded by the mask blend below).
    mean = jnp.mean(y, axis=0, keepdims=True)                         # (1, C2)
    var = jnp.mean(jnp.square(y - mean), axis=0, keepdims=True)       # (1, C2)
    y_in = (y - mean) * jax.lax.rsqrt(var + eps)

    m = m_ref[...]                         # 1.0 on IN channels, 0.0 on BN channels
    y_sel = y_in * m + y * (1.0 - m)
    z = y_sel * g_ref[...] + b_ref[...]    # IN affine / folded BN bias
    o_ref[0] = (z * jax.nn.sigmoid(z)).astype(o_ref.dtype)            # SiLU


def focus_with_ibn(x, weight, in_gamma, in_beta, bn_gamma, bn_beta,
                   bn_mean, bn_var, *, eps=1e-5):
    """FocuswithIBN forward. x: (N, C1, H, W); weight: (C2, 4*C1, 1, 1) (Conv2d layout)."""
    N, C1, H, W = x.shape
    assert H % 2 == 0 and W % 2 == 0, "Focus needs even spatial dims"
    C2, C14 = weight.shape[0], weight.shape[1]
    assert C14 == 4 * C1
    half = in_gamma.shape[0]
    H2, W2 = H // 2, W // 2
    S = H2 * W2

    # ---- Focus: space-to-depth, channel order matching the torch.cat in the module.
    xf = jnp.concatenate(
        [x[:, :, 0::2, 0::2], x[:, :, 1::2, 0::2],
         x[:, :, 0::2, 1::2], x[:, :, 1::2, 1::2]], axis=1)           # (N, 4C1, H2, W2)
    # NCHW -> NHWC-flattened: channels on the lane axis.
    x_mat = jnp.transpose(xf, (0, 2, 3, 1)).reshape(N, S, C14)

    # ---- Conv weight (C2, 4C1, 1, 1) -> (4C1, C2); fold eval-mode BN scale into the
    #      BN half of the columns (exact fold: X @ (W * diag(s)) == (X @ W) * s).
    w_mat = jnp.transpose(weight.reshape(C2, C14), (1, 0))
    bn_scale = bn_gamma * jax.lax.rsqrt(bn_var + eps)                 # (C2-half,)
    col_scale = jnp.concatenate([jnp.ones((half,), w_mat.dtype), bn_scale])
    w_mat = w_mat * col_scale[None, :]

    g_vec = jnp.concatenate([in_gamma, jnp.ones((C2 - half,), jnp.float32)])[None, :]
    b_vec = jnp.concatenate([in_beta, bn_beta - bn_mean * bn_scale])[None, :]
    m_vec = jnp.concatenate([jnp.ones((half,), jnp.float32),
                             jnp.zeros((C2 - half,), jnp.float32)])[None, :]

    kernel = functools.partial(_focus_ibn_silu_kernel, eps=eps)
    out = pl.pallas_call(
        kernel,
        out_shape=jax.ShapeDtypeStruct((N, S, C2), x.dtype),
        grid_spec=pltpu.PrefetchScalarGridSpec(
            num_scalar_prefetch=0,
            grid=(N,),
            in_specs=[
                pl.BlockSpec((1, S, C14), lambda n: (n, 0, 0)),   # per-sample input
                pl.BlockSpec((C14, C2), lambda n: (0, 0)),        # weight (resident)
                pl.BlockSpec((1, C2), lambda n: (0, 0)),          # gamma
                pl.BlockSpec((1, C2), lambda n: (0, 0)),          # bias
                pl.BlockSpec((1, C2), lambda n: (0, 0)),          # IN/BN mask
            ],
            out_specs=pl.BlockSpec((1, S, C2), lambda n: (n, 0, 0)),
        ),
        compiler_params=pltpu.CompilerParams(
            dimension_semantics=("parallel",)),
    )(x_mat, w_mat, g_vec, b_vec, m_vec)

    # (N, S, C2) -> (N, C2, H/2, W/2)
    return jnp.transpose(out.reshape(N, H2, W2, C2), (0, 3, 1, 2))


def _reference(x, weight, in_gamma, in_beta, bn_gamma, bn_beta, bn_mean, bn_var,
               eps=1e-5):
    """Pure-JAX reference matching Focus + Conv2d(1x1) + IBN(eval BN) + SiLU."""
    xf = jnp.concatenate(
        [x[:, :, 0::2, 0::2], x[:, :, 1::2, 0::2],
         x[:, :, 0::2, 1::2], x[:, :, 1::2, 1::2]], axis=1)
    y = jax.lax.conv_general_dilated(
        xf, weight, window_strides=(1, 1), padding='VALID',
        dimension_numbers=('NCHW', 'OIHW', 'NCHW'))                    # (N, C2, H2, W2)
    half = in_gamma.shape[0]
    y1 = y[:, :half]
    mu = jnp.mean(y1, axis=(2, 3), keepdims=True)
    var = jnp.mean(jnp.square(y1 - mu), axis=(2, 3), keepdims=True)
    y1 = (y1 - mu) / jnp.sqrt(var + eps)
    y1 = y1 * in_gamma[None, :, None, None] + in_beta[None, :, None, None]
    s = bn_gamma / jnp.sqrt(bn_var + eps)
    b = bn_beta - bn_mean * s
    y2 = y[:, half:] * s[None, :, None, None] + b[None, :, None, None]
    z = jnp.concatenate([y1, y2], axis=1)
    return z * jax.nn.sigmoid(z)


if __name__ == "__main__":
    # FocuswithIBN(c1=4, c2=32, k=1, s=1, act=True): conv sees 16 input channels,
    # IBN splits 32 output channels into 16 IN + 16 BN.
    N, C1, H, W = 2, 4, 16, 16
    C2 = 32
    half = C2 // 2

    key = jax.random.PRNGKey(0)
    kx, kw, k1, k2, k3, k4, k5, k6 = jax.random.split(key, 8)

    x = jax.random.normal(kx, (N, C1, H, W), dtype=jnp.float32)
    weight = jax.random.normal(kw, (C2, 4 * C1, 1, 1), dtype=jnp.float32) * 0.1
    in_gamma = 1.0 + 0.1 * jax.random.normal(k1, (half,), dtype=jnp.float32)
    in_beta = 0.1 * jax.random.normal(k2, (half,), dtype=jnp.float32)
    bn_gamma = 1.0 + 0.1 * jax.random.normal(k3, (C2 - half,), dtype=jnp.float32)
    bn_beta = 0.1 * jax.random.normal(k4, (C2 - half,), dtype=jnp.float32)
    bn_mean = 0.1 * jax.random.normal(k5, (C2 - half,), dtype=jnp.float32)
    bn_var = jnp.abs(jax.random.normal(k6, (C2 - half,), dtype=jnp.float32)) + 0.5

    out = focus_with_ibn(x, weight, in_gamma, in_beta, bn_gamma, bn_beta,
                         bn_mean, bn_var)
    out = jax.block_until_ready(out)

    ref = _reference(x, weight, in_gamma, in_beta, bn_gamma, bn_beta,
                     bn_mean, bn_var)
    np.testing.assert_allclose(np.asarray(out), np.asarray(ref),
                               rtol=2e-4, atol=2e-5)
    assert out.shape == (N, C2, H // 2, W // 2)
    print("KERNEL_OK")
</pallas_src>

<mosaic_0001>
module attributes {stable_mosaic.version = 11 : i64} {
  func.func @_focus_ibn_silu_kernel(%arg0: i32, %arg1: memref<1x64x16xf32, #tpu.memory_space<vmem>>, %arg2: memref<16x32xf32, #tpu.memory_space<vmem>>, %arg3: memref<1x32xf32, #tpu.memory_space<vmem>>, %arg4: memref<1x32xf32, #tpu.memory_space<vmem>>, %arg5: memref<1x32xf32, #tpu.memory_space<vmem>>, %arg6: memref<1x64x32xf32, #tpu.memory_space<vmem>>) attributes {dimension_semantics = [#tpu.dimension_semantics<parallel>], iteration_bounds = array<i64: 2>, scalar_prefetch = 0 : i64, scratch_operands = 0 : i64, tpu.core_type = #tpu.core_type<tc>, window_params = [{transform_indices = @transform_0, window_bounds = array<i64: 1, 64, 16>}, {pipeline_mode = #tpu.pipeline_mode<synchronous>, transform_indices = @transform_1, window_bounds = array<i64: 16, 32>}, {pipeline_mode = #tpu.pipeline_mode<synchronous>, transform_indices = @transform_2, window_bounds = array<i64: 1, 32>}, {pipeline_mode = #tpu.pipeline_mode<synchronous>, transform_indices = @transform_3, window_bounds = array<i64: 1, 32>}, {pipeline_mode = #tpu.pipeline_mode<synchronous>, transform_indices = @transform_4, window_bounds = array<i64: 1, 32>}, {transform_indices = @transform_5, window_bounds = array<i64: 1, 64, 32>}]} {
    %c0 = arith.constant 0 : index
    %c0_0 = arith.constant 0 : index
    %c0_1 = arith.constant 0 : index
    %0 = vector.load %arg1[%c0, %c0_0, %c0_1] : memref<1x64x16xf32, #tpu.memory_space<vmem>>, vector<1x64x16xf32>
    %1 = vector.shape_cast %0 : vector<1x64x16xf32> to vector<64x16xf32>
    %c0_2 = arith.constant 0 : index
    %c0_3 = arith.constant 0 : index
    %2 = vector.load %arg2[%c0_2, %c0_3] : memref<16x32xf32, #tpu.memory_space<vmem>>, vector<16x32xf32>
    %cst = arith.constant dense<0.000000e+00> : vector<64x32xf32>
    %3 = tpu.matmul %1, %2, %cst {dimension_numbers = #tpu.dot_dimension_numbers<[1], [0], [0], [1], [0, 0, 1, 1], [], []>} : vector<64x16xf32>, vector<16x32xf32>, vector<64x32xf32> -> vector<64x32xf32>
    %cst_4 = arith.constant dense<0.000000e+00> : vector<32xf32>
    %4 = vector.multi_reduction <add>, %3, %cst_4 [0] : vector<64x32xf32> to vector<32xf32>
    %5 = vector.shape_cast %4 : vector<32xf32> to vector<1x32xf32>
    %cst_5 = arith.constant 6.400000e+01 : f32
    %6 = vector.broadcast %cst_5 : f32 to vector<1x32xf32>
    %7 = arith.divf %5, %6 : vector<1x32xf32>
    %8 = vector.broadcast %7 : vector<1x32xf32> to vector<64x32xf32>
    %9 = arith.subf %3, %8 : vector<64x32xf32>
    %10 = arith.mulf %9, %9 : vector<64x32xf32>
    %cst_6 = arith.constant dense<0.000000e+00> : vector<32xf32>
    %11 = vector.multi_reduction <add>, %10, %cst_6 [0] : vector<64x32xf32> to vector<32xf32>
    %12 = vector.shape_cast %11 : vector<32xf32> to vector<1x32xf32>
    %cst_7 = arith.constant 6.400000e+01 : f32
    %13 = vector.broadcast %cst_7 : f32 to vector<1x32xf32>
    %14 = arith.divf %12, %13 : vector<1x32xf32>
    %15 = vector.broadcast %7 : vector<1x32xf32> to vector<64x32xf32>
    %16 = arith.subf %3, %15 : vector<64x32xf32>
    %cst_8 = arith.constant 9.99999974E-6 : f32
    %17 = vector.broadcast %cst_8 : f32 to vector<1x32xf32>
    %18 = arith.addf %14, %17 : vector<1x32xf32>
    %19 = math.rsqrt %18 : vector<1x32xf32>
    %20 = vector.broadcast %19 : vector<1x32xf32> to vector<64x32xf32>
    %21 = arith.mulf %16, %20 : vector<64x32xf32>
    %c0_9 = arith.constant 0 : index
    %c0_10 = arith.constant 0 : index
    %22 = vector.load %arg5[%c0_9, %c0_10] : memref<1x32xf32, #tpu.memory_space<vmem>>, vector<1x32xf32>
    %23 = vector.broadcast %22 : vector<1x32xf32> to vector<64x32xf32>
    %24 = arith.mulf %21, %23 : vector<64x32xf32>
    %cst_11 = arith.constant 1.000000e+00 : f32
    %25 = vector.broadcast %cst_11 : f32 to vector<1x32xf32>
    %26 = arith.subf %25, %22 : vector<1x32xf32>
    %27 = vector.broadcast %26 : vector<1x32xf32> to vector<64x32xf32>
    %28 = arith.mulf %3, %27 : vector<64x32xf32>
    %29 = arith.addf %24, %28 : vector<64x32xf32>
    %c0_12 = arith.constant 0 : index
    %c0_13 = arith.constant 0 : index
    %30 = vector.load %arg3[%c0_12, %c0_13] : memref<1x32xf32, #tpu.memory_space<vmem>>, vector<1x32xf32>
    %31 = vector.broadcast %30 : vector<1x32xf32> to vector<64x32xf32>
    %32 = arith.mulf %29, %31 : vector<64x32xf32>
    %c0_14 = arith.constant 0 : index
    %c0_15 = arith.constant 0 : index
    %33 = vector.load %arg4[%c0_14, %c0_15] : memref<1x32xf32, #tpu.memory_space<vmem>>, vector<1x32xf32>
    %34 = vector.broadcast %33 : vector<1x32xf32> to vector<64x32xf32>
    %35 = arith.addf %32, %34 : vector<64x32xf32>
    %36 = arith.negf %35 : vector<64x32xf32>
    %37 = math.exp %36 : vector<64x32xf32>
    %cst_16 = arith.constant 1.000000e+00 : f32
    %38 = vector.broadcast %cst_16 : f32 to vector<64x32xf32>
    %39 = arith.addf %38, %37 : vector<64x32xf32>
    %40 = arith.divf %38, %39 : vector<64x32xf32>
    %41 = arith.mulf %35, %40 : vector<64x32xf32>
    %c0_17 = arith.constant 0 : index
    %c0_18 = arith.constant 0 : index
    %c0_19 = arith.constant 0 : index
    %42 = vector.load %arg6[%c0_17, %c0_18, %c0_19] : memref<1x64x32xf32, #tpu.memory_space<vmem>>, vector<1x64x32xf32>
    %43 = vector.shape_cast %42 : vector<1x64x32xf32> to vector<64x32xf32>
    %44 = vector.shape_cast %41 : vector<64x32xf32> to vector<1x64x32xf32>
    tpu.vector_store %arg6[%c0_17, %c0_18, %c0_19], %44 {strides = array<i32>} : memref<1x64x32xf32, #tpu.memory_space<vmem>>, vector<1x64x32xf32>,
    return
  }
  func.func @transform_0(%arg0: i32) -> (i32, i32, i32) {
    %c0_i32 = arith.constant 0 : i32
    %c0_i32_0 = arith.constant 0 : i32
    %c0_i32_1 = arith.constant 0 : i32
    return %arg0, %c0_i32, %c0_i32_0 : i32, i32, i32
  }
  func.func @transform_1(%arg0: i32) -> (i32, i32) {
    %c0_i32 = arith.constant 0 : i32
    %c0_i32_0 = arith.constant 0 : i32
    %c0_i32_1 = arith.constant 0 : i32
    return %c0_i32, %c0_i32_0 : i32, i32
  }
  func.func @transform_2(%arg0: i32) -> (i32, i32) {
    %c0_i32 = arith.constant 0 : i32
    %c0_i32_0 = arith.constant 0 : i32
    %c0_i32_1 = arith.constant 0 : i32
    return %c0_i32, %c0_i32_0 : i32, i32
  }
  func.func @transform_3(%arg0: i32) -> (i32, i32) {
    %c0_i32 = arith.constant 0 : i32
    %c0_i32_0 = arith.constant 0 : i32
    %c0_i32_1 = arith.constant 0 : i32
    return %c0_i32, %c0_i32_0 : i32, i32
  }
  func.func @transform_4(%arg0: i32) -> (i32, i32) {
    %c0_i32 = arith.constant 0 : i32
    %c0_i32_0 = arith.constant 0 : i32
    %c0_i32_1 = arith.constant 0 : i32
    return %c0_i32, %c0_i32_0 : i32, i32
  }
  func.func @transform_5(%arg0: i32) -> (i32, i32, i32) {
    %c0_i32 = arith.constant 0 : i32
    %c0_i32_0 = arith.constant 0 : i32
    %c0_i32_1 = arith.constant 0 : i32
    return %arg0, %c0_i32, %c0_i32_0 : i32, i32, i32
  }
}

</mosaic_0001>

<bundles_post_ra>
// kernel: tpu_custom_call.1
= control target key start
LH: loop header
LB: loop body
LE: loop exit
PB: predicated region body
PF: predicated region fallthrough
CT: control target
= control target key end

     0   :  { %s789_s18 = smov 0   ;;  %s1084_s0 = inlined_call_operand.vmem [shape: f32[2,64,16], index: 0, kind: input, shape index: {}]   ;;  %s1085_s1 = inlined_call_operand.vmem [shape: f32[16,32], index: 1, kind: input, shape index: {}]   ;;  %s1086_s2 = inlined_call_operand.vmem [shape: f32[1,32], index: 2, kind: input, shape index: {}]   ;;  %s1087_s3 = inlined_call_operand.vmem [shape: f32[1,32], index: 3, kind: input, shape index: {}]   ;;  %s1088_s4 = inlined_call_operand.vmem [shape: f32[1,32], index: 4, kind: input, shape index: {}]   ;;  %s1089_s5 = inlined_call_operand.vmem [shape: f32[2,64,32], index: 5, kind: output, shape index: {}]  }
   0x1 LB: > { %s667_s19 = sadd.s32 4294967295, %s756_s18   ;;  %p671_p0 = scmp.ge.s32.totalorder %s756_s18, 1  ;;  %s756_s18 = sphi %s789_s18, %s15_s18  }
   0x2   : > { %p187_p1 = scmp.lt.s32.totalorder %s756_s18, 3 }
   0x4   : > { %p188_p2 = pnand %p671_p0, %p187_p1 }
   0x5   : > { %p215_p3 = scmp.lt.s32.totalorder (!%p188_p2), %s667_s19, 1 }
   0x6   : > { %191 = sbr.rel (%p188_p2) target bundleno = 291 (0x123), region = 40 }
   0xb   : > { %v234_v0 = vld [vmem:[%s1085_s1 + $0x8] sm:$0xff]  ;;  %v233_v1 = vld [vmem:[%s1085_s1] sm:$0xff]  ;;  %s1107_s19 = smov (!%p215_p3, %s667_s19), 1  ;;  %vm235_vm0 = vcmask 130048   ;;  %vm301_vm1 = vcmask 261120   ;;  %v758_v15 = vmov 64.0  }
   0xc   : > { %274 = vmatpush.msra.mxu0 %v234_v0  ;;  %697 = vmatpush.msra.mxu2 %v234_v0  ;;  %s694_s24 = sshll.u32 %s1107_s19, 6  ;;  %714 = vrcp.f32 %v758_v15 }
   0xd   : > { %696 = vmatpush.msra.mxu1 %v234_v0  ;;  %698 = vmatpush.msra.mxu3 %v234_v0  ;;  %s219_s27 = scalar_lea.vmem %s1084_s0, %s694_s24  ;;  %s1044_s13 = scalar_lea.vmem %s1089_s5, %s694_s24 }
   0xe   : > { %275 = vmatpush.msra.mxu0 %v233_v1  ;;  %700 = vmatpush.msra.mxu2 %v233_v1  ;;  %v225_v2 = vld [vmem:[%s219_s27] sm:$0xff]  ;;  %v227_v4 = vld [vmem:[%s219_s27 + $0x10] sm:$0xff]  ;;  %v226_v6 = vld [vmem:[%s219_s27 + $0x8] sm:$0xff] }
   0xf   : > { %699 = vmatpush.msra.mxu1 %v233_v1  ;;  %701 = vmatpush.msra.mxu3 %v233_v1  ;;  %v229_v3 = vld [vmem:[%s219_s27 + $0x20] sm:$0xff]  ;;  %v231_v5 = vld [vmem:[%s219_s27 + $0x30] sm:$0xff]  ;;  %v230_v7 = vld [vmem:[%s219_s27 + $0x28] sm:$0xff] }
  0x10   : > { %676 = vmatmul.msk.f32.vlgmr.msra.gmra.mxu0 %vm235_vm0, %v225_v2  ;;  %680 = vmatmul.msk.f32.vlgmr.msra.gmra.mxu2 %vm235_vm0, %v229_v3  ;;  %v228_v8 = vld [vmem:[%s219_s27 + $0x18] sm:$0xff] }
  0x11   : > { %678 = vmatmul.msk.f32.vlgmr.msra.gmra.mxu1 %vm235_vm0, %v227_v4  ;;  %682 = vmatmul.msk.f32.vlgmr.msra.gmra.mxu3 %vm235_vm0, %v231_v5  ;;  %v232_v9 = vld [vmem:[%s219_s27 + $0x38] sm:$0xff] }
  0x12   : > { %v715_v23 = vpop.eup %714 }
  0x13   : > { %v324_v30 = vmul.f32 64.0, %v715_v23  ;;  %vm328_vm2 = vweird.f32 %v715_v23 }
  0x15   : > { %v325_v35 = vsub.f32 1.0, %v324_v30  ;;  %v388_v30 = vld [vmem:[%s1088_s4] sm:$0x1] }
  0x17   : > { %v326_v38 = vmul.f32 %v715_v23, %v325_v35 }
  0x18   : > { %677 = vmatmul.msk.f32.gmra.mxu0 %vm235_vm0, %v226_v6  ;;  %681 = vmatmul.msk.f32.gmra.mxu2 %vm235_vm0, %v230_v7 }
  0x19   : > { %679 = vmatmul.msk.f32.gmra.mxu1 %vm235_vm0, %v228_v8  ;;  %683 = vmatmul.msk.f32.gmra.mxu3 %vm235_vm0, %v232_v9  ;;  %v327_v41 = vadd.f32 %v715_v23, %v326_v38 }
  0x1b   : > { %v329_v44 = vsel %vm328_vm2, %v715_v23, %v327_v41 }
  0x8d   : > { %v819_v10 = vpop.f32.mrf.mxu0 }
  0x8e   : > { %v821_v11 = vpop.f32.mrf.mxu1  ;;  %v302_v16 = vsel %vm301_vm1, %v819_v10, 0.0 }
  0x8f   : > { %v305_v20 = vsel %vm301_vm1, %v821_v11, 0.0 }
  0x93   : > { %v823_v12 = vpop.f32.mrf.mxu2 }
  0x94   : > { %v825_v13 = vpop.f32.mrf.mxu3  ;;  %v309_v26 = vsel %vm301_vm1, %v823_v12, 0.0 }
  0x95   : > { %v827_v14 = vpop.f32.mrf.mxu0  ;;  %v313_v32 = vsel %vm301_vm1, %v825_v13, 0.0 }
  0x96   : > { %v303_v17 = vsel %vm301_vm1, %v827_v14, 0.0  ;;  %v833_v18 = vpop.f32.mrf.mxu1 }
  0x97   : > { %v304_v19 = vadd.f32 %v303_v17, %v302_v16  ;;  %v307_v21 = vsel %vm301_vm1, %v833_v18, 0.0 }
  0x99   : > { %v306_v22 = vadd.f32 %v305_v20, %v304_v19 }
  0x9b   : > { %v308_v24 = vadd.f32 %v307_v21, %v306_v22  ;;  %v839_v25 = vpop.f32.mrf.mxu2 }
  0x9c   : > { %v311_v27 = vsel %vm301_vm1, %v839_v25, 0.0  ;;  %v845_v29 = vpop.f32.mrf.mxu3 }
  0x9d   : > { %v310_v28 = vadd.f32 %v309_v26, %v308_v24  ;;  %v315_v33 = vsel %vm301_vm1, %v845_v29, 0.0 }
  0x9f   : > { %v312_v31 = vadd.f32 %v311_v27, %v310_v28 }
  0xa1   : > { %v314_v34 = vadd.f32 %v313_v32, %v312_v31  ;;  %v400_v32 = vsub.f32 1.0, %v388_v30 }
  0xa3   : > { %v316_v36 = vadd.f32 %v315_v33, %v314_v34  ;;  %v402_v35 = vperm.slane %v400_v32, 0 }
  0xa5   : > { %v317_v37 = vrot.slane %v316_v36, 4  ;;  %v404_v38 = vmul.f32 %v402_v35, %v819_v10  ;;  %v405_v41 = vmul.f32 %v402_v35, %v827_v14 }
  0xa7   : > { %v318_v39 = vadd.f32 %v317_v37, %v316_v36 }
  0xa9   : > { %v319_v40 = vrot.slane %v318_v39, 2 }
  0xab   : > { %v320_v42 = vadd.f32 %v319_v40, %v318_v39  ;;  %v406_v40 = vmul.f32 %v402_v35, %v821_v11 }
  0xad   : > { %v321_v43 = vrot.slane %v320_v42, 1 }
  0xaf   : > { %v322_v45 = vadd.f32 %v321_v43, %v320_v42  ;;  %v408_v42 = vmul.f32 %v402_v35, %v823_v12  ;;  %v410_v43 = vmul.f32 %v402_v35, %v825_v13 }
  0xb1   : > { %v330_v46 = vmul.f32 %v329_v44, %v322_v45  ;;  %v407_v45 = vmul.f32 %v402_v35, %v833_v18 }
  0xb3   : > { %v331_v47 = vsub.f32 %v819_v10, %v330_v46  ;;  %v332_v48 = vsub.f32 %v827_v14, %v330_v46  ;;  %v333_v49 = vsub.f32 %v821_v11, %v330_v46  ;;  %v334_v50 = vsub.f32 %v833_v18, %v330_v46  ;;  %v712_v18 = vld [vmem:[%s1086_s2] ss:$0 sm:$0xff] }
  0xb4   : > { %v335_v51 = vsub.f32 %v823_v12, %v330_v46  ;;  %v336_v55 = vsub.f32 %v839_v25, %v330_v46  ;;  %v337_v60 = vsub.f32 %v825_v13, %v330_v46  ;;  %v338_v0 = vsub.f32 %v845_v29, %v330_v46 }
  0xb5   : > { %v339_v52 = vmul.f32 %v331_v47, %v331_v47  ;;  %v340_v53 = vmul.f32 %v332_v48, %v332_v48  ;;  %v341_v54 = vmul.f32 %v333_v49, %v333_v49  ;;  %v342_v56 = vmul.f32 %v334_v50, %v334_v50 }
  0xb6   : > { %v343_v61 = vmul.f32 %v335_v51, %v335_v51  ;;  %v344_v1 = vmul.f32 %v336_v55, %v336_v55  ;;  %v345_v4 = vmul.f32 %v337_v60, %v337_v60  ;;  %v346_v7 = vmul.f32 %v338_v0, %v338_v0 }
  0xb7   : > { %v347_v57 = vsel %vm301_vm1, %v339_v52, 0.0  ;;  %v348_v58 = vsel %vm301_vm1, %v340_v53, 0.0  ;;  %v350_v62 = vsel %vm301_vm1, %v341_v54, 0.0  ;;  %v352_v2 = vsel %vm301_vm1, %v342_v56, 0.0 }
  0xb8   : > { %v349_v59 = vadd.f32 %v348_v58, %v347_v57  ;;  %v354_v5 = vsel %vm301_vm1, %v343_v61, 0.0  ;;  %v356_v8 = vsel %vm301_vm1, %v344_v1, 0.0  ;;  %v358_v15 = vsel %vm301_vm1, %v345_v4, 0.0 }
  0xb9   : > { %v360_v17 = vsel %vm301_vm1, %v346_v7, 0.0  ;;  %v409_v46 = vmul.f32 %v402_v35, %v839_v25  ;;  %v411_v52 = vmul.f32 %v402_v35, %v845_v29 }
  0xba   : > { %v351_v63 = vadd.f32 %v350_v62, %v349_v59 }
  0xbc   : > { %v353_v3 = vadd.f32 %v352_v2, %v351_v63 }
  0xbe   : > { %v355_v6 = vadd.f32 %v354_v5, %v353_v3 }
  0xc0   : > { %v357_v9 = vadd.f32 %v356_v8, %v355_v6 }
  0xc2   : > { %v359_v16 = vadd.f32 %v358_v15, %v357_v9 }
  0xc4   : > { %v361_v19 = vadd.f32 %v360_v17, %v359_v16 }
  0xc6   : > { %v362_v20 = vrot.slane %v361_v19, 4 }
  0xc8   : > { %v363_v21 = vadd.f32 %v362_v20, %v361_v19 }
  0xca   : > { %v364_v22 = vrot.slane %v363_v21, 2 }
  0xcc   : > { %v365_v23 = vadd.f32 %v364_v22, %v363_v21 }
  0xce   : > { %v366_v24 = vrot.slane %v365_v23, 1 }
  0xd0   : > { %v367_v26 = vadd.f32 %v366_v24, %v365_v23 }
  0xd2   : > { %v368_v27 = vmul.f32 %v367_v26, %v329_v44  ;;  %v711_v44 = vld [vmem:[%s1088_s4] ss:$0 sm:$0xff] }
  0xd4   : > { %v369_v28 = vadd.f32 1e-05, %v368_v27 }
  0xd6   : > { %716 = vrsqrt.f32 %v369_v28  ;;  %vm376_vm4 = vweird.f32 %v369_v28 }
  0xdc   : > { %v717_v31 = vpop.eup %716 }
  0xdd   : > { %v371_v33 = vmul.f32 %v717_v31, %v369_v28  ;;  %vm377_vm3 = vweird.f32 %v717_v31 }
  0xde   : > { %vm378_vm5 = vmor %vm376_vm4, %vm377_vm3 }
  0xdf   : > { %v372_v34 = vmul.f32 %v717_v31, %v371_v33 }
  0xe1   : > { %v373_v36 = vmul.f32 0.5, %v372_v34 }
  0xe3   : > { %v374_v37 = vsub.f32 1.5, %v373_v36 }
  0xe5   : > { %v375_v39 = vmul.f32 %v717_v31, %v374_v37 }
  0xe7   : > { %v379_v10 = vsel %vm378_vm5, %v717_v31, %v375_v39 }
  0xe8   : > { %v380_v53 = vmul.f32 %v379_v10, %v331_v47  ;;  %v381_v11 = vmul.f32 %v379_v10, %v332_v48  ;;  %v382_v54 = vmul.f32 %v379_v10, %v333_v49  ;;  %v383_v14 = vmul.f32 %v379_v10, %v334_v50 }
  0xe9   : > { %v384_v56 = vmul.f32 %v379_v10, %v335_v51  ;;  %v385_v12 = vmul.f32 %v379_v10, %v336_v55  ;;  %v386_v57 = vmul.f32 %v379_v10, %v337_v60  ;;  %v387_v13 = vmul.f32 %v379_v10, %v338_v0  ;;  %v713_v51 = vld [vmem:[%s1087_s3] ss:$0 sm:$0xff] }
  0xea   : > { %v392_v58 = vmul.f32 %v711_v44, %v380_v53  ;;  %v393_v59 = vmul.f32 %v711_v44, %v381_v11  ;;  %v394_v61 = vmul.f32 %v711_v44, %v382_v54  ;;  %v395_v62 = vmul.f32 %v711_v44, %v383_v14 }
  0xeb   : > { %v396_v25 = vmul.f32 %v711_v44, %v384_v56  ;;  %v397_v63 = vmul.f32 %v711_v44, %v385_v12  ;;  %v398_v1 = vmul.f32 %v711_v44, %v386_v57  ;;  %v399_v29 = vmul.f32 %v711_v44, %v387_v13 }
  0xec   : > { %v412_v47 = vadd.f32 %v404_v38, %v392_v58  ;;  %v413_v48 = vadd.f32 %v405_v41, %v393_v59  ;;  %v414_v49 = vadd.f32 %v406_v40, %v394_v61  ;;  %v415_v50 = vadd.f32 %v407_v45, %v395_v62 }
  0xed   : > { %v416_v55 = vadd.f32 %v408_v42, %v396_v25  ;;  %v417_v60 = vadd.f32 %v409_v46, %v397_v63  ;;  %v418_v0 = vadd.f32 %v410_v43, %v398_v1  ;;  %v419_v2 = vadd.f32 %v411_v52, %v399_v29 }
  0xee   : > { %v424_v3 = vmul.f32 %v712_v18, %v412_v47  ;;  %v425_v4 = vmul.f32 %v712_v18, %v413_v48  ;;  %v426_v5 = vmul.f32 %v712_v18, %v414_v49  ;;  %v427_v6 = vmul.f32 %v712_v18, %v415_v50 }
  0xef   : > { %v428_v7 = vmul.f32 %v712_v18, %v416_v55  ;;  %v429_v8 = vmul.f32 %v712_v18, %v417_v60  ;;  %v430_v9 = vmul.f32 %v712_v18, %v418_v0  ;;  %v431_v15 = vmul.f32 %v712_v18, %v419_v2 }
  0xf0   : > { %v887_v16 = vadd.f32 %v713_v51, %v424_v3  ;;  %v889_v17 = vadd.f32 %v713_v51, %v425_v4  ;;  %v891_v19 = vadd.f32 %v713_v51, %v426_v5  ;;  %v893_v20 = vadd.f32 %v713_v51, %v427_v6 }
  0xf1   : > { %v895_v21 = vadd.f32 %v713_v51, %v428_v7  ;;  %v897_v22 = vadd.f32 %v713_v51, %v429_v8  ;;  %v902_v27 = vadd.f32 %v713_v51, %v430_v9  ;;  %v905_v30 = vadd.f32 %v713_v51, %v431_v15 }
  0xf2   : > { %v684_v23 = vmul.f32 -1.442695, %v887_v16  ;;  %v685_v24 = vmul.f32 -1.442695, %v889_v17  ;;  %v686_v26 = vmul.f32 -1.442695, %v891_v19 }
  0xf3   : > { %v687_v28 = vmul.f32 -1.442695, %v893_v20  ;;  %v688_v31 = vmul.f32 -1.442695, %v895_v21  ;;  %v689_v32 = vmul.f32 -1.442695, %v897_v22 }
  0xf4   : > { %718 = vpow2.f32 %v684_v23  ;;  %v690_v33 = vmul.f32 -1.442695, %v902_v27  ;;  %v691_v34 = vmul.f32 -1.442695, %v905_v30 }
  0xf5   : > { %720 = vpow2.f32 %v685_v24 }
  0xf6   : > { %722 = vpow2.f32 %v686_v26 }
  0xf7   : > { %724 = vpow2.f32 %v687_v28 }
  0xf8   : > { %726 = vpow2.f32 %v688_v31 }
  0xf9   : > { %728 = vpow2.f32 %v689_v32 }
  0xfa   : > { %v719_v35 = vpop.eup %718  ;;  %730 = vpow2.f32 %v690_v33 }
  0xfb   : > { %v721_v36 = vpop.eup %720  ;;  %v911_v37 = vadd.f32 1.0, %v719_v35  ;;  %732 = vpow2.f32 %v691_v34 }
  0xfc   : > { %v723_v38 = vpop.eup %722  ;;  %v913_v39 = vadd.f32 1.0, %v721_v36 }
  0xfd   : > { %v725_v40 = vpop.eup %724  ;;  %v915_v41 = vadd.f32 1.0, %v723_v38  ;;  %734 = vrcp.f32 %v911_v37  ;;  %v487_v46 = vand.u32 2147483648, %v911_v37  ;;  %vm481_vm6 = vweird.f32 %v911_v37 }
  0xfe   : > { %v727_v42 = vpop.eup %726  ;;  %v918_v43 = vadd.f32 1.0, %v725_v40  ;;  %736 = vrcp.f32 %v913_v39  ;;  %v502_v52 = vand.u32 2147483648, %v913_v39  ;;  %v485_v14 = vand.u32 2147483647, %v911_v37 }
  0xff   : > { %v729_v44 = vpop.eup %728  ;;  %v921_v45 = vadd.f32 1.0, %v727_v42  ;;  %738 = vrcp.f32 %v915_v41  ;;  %v488_v57 = vor.u32 1.1754944e-38, %v487_v46  ;;  %vm496_vm7 = vweird.f32 %v913_v39 }
 0x100   : > { %v731_v10 = vpop.eup %730  ;;  %v926_v11 = vadd.f32 1.0, %v729_v44  ;;  %740 = vrcp.f32 %v918_v43  ;;  %v500_v13 = vand.u32 2147483647, %v913_v39  ;;  %v517_v58 = vand.u32 2147483648, %v915_v41 }
 0x101   : > { %v733_v53 = vpop.eup %732  ;;  %742 = vrcp.f32 %v921_v45  ;;  %v941_v59 = vadd.f32 1.0, %v731_v10  ;;  %v503_v62 = vor.u32 1.1754944e-38, %v502_v52  ;;  %vm511_vm8 = vweird.f32 %v915_v41 }
 0x102   : > { %v515_v18 = vand.u32 2147483647, %v915_v41  ;;  %v949_v63 = vadd.f32 1.0, %v733_v53  ;;  %v530_v29 = vand.u32 2147483647, %v918_v43  ;;  %744 = vrcp.f32 %v926_v11 }
 0x103   : > { %v929_v54 = vpop.eup %734  ;;  %vm954_vm10 = vcmp.eq.f32.partialorder %v485_v14, 8.507059e+37  ;;  %vm526_vm11 = vweird.f32 %v918_v43  ;;  %v532_v50 = vand.u32 2147483648, %v918_v43  ;;  %vm963_vm12 = vcmp.eq.f32.partialorder %v500_v13, 8.507059e+37 }
 0x104   : > { %v934_v56 = vpop.eup %736  ;;  %v477_v12 = vmul.f32 %v929_v54, %v911_v37  ;;  %vm482_vm9 = vweird.f32 %v929_v54  ;;  %v518_v0 = vor.u32 1.1754944e-38, %v517_v58  ;;  %vm541_vm13 = vweird.f32 %v921_v45 }
 0x105   : > { %v492_v61 = vmul.f32 %v934_v56, %v913_v39  ;;  %v947_v25 = vpop.eup %738  ;;  %v545_v2 = vand.u32 2147483647, %v921_v45  ;;  %vm497_vm14 = vweird.f32 %v934_v56  ;;  %vm971_vm15 = vcmp.eq.f32.partialorder %v515_v18, 8.507059e+37  ;;  %vm990_vm3 = vmor %vm481_vm6, %vm482_vm9 }
 0x106   : > { %v478_v1 = vsub.f32 1.0, %v477_v12  ;;  %v507_v49 = vmul.f32 %v947_v25, %v915_v41  ;;  %v741_v51 = vpop.eup %740  ;;  %vm977_vm0 = vcmp.eq.f32.partialorder %v530_v29, 8.507059e+37  ;;  %v547_v23 = vand.u32 2147483648, %v921_v45  ;;  %vm1006_vm5 = vmor %vm496_vm7, %vm497_vm14 }
 0x107   : > { %v493_v48 = vsub.f32 1.0, %v492_v61  ;;  %v743_v3 = vpop.eup %742  ;;  %v522_v7 = vmul.f32 %v741_v51, %v918_v43  ;;  %vm512_vm2 = vweird.f32 %v947_v25  ;;  %v533_v33 = vor.u32 1.1754944e-38, %v532_v50 }
 0x108   : > { %v479_v55 = vmul.f32 %v929_v54, %v478_v1  ;;  %v508_v5 = vsub.f32 1.0, %v507_v49  ;;  %v537_v15 = vmul.f32 %v743_v3, %v921_v45  ;;  %v745_v31 = vpop.eup %744  ;;  %vm994_vm4 = vcmp.eq.f32.partialorder %v545_v2, 8.507059e+37  ;;  %vm1016_vm9 = vmor %vm511_vm8, %vm512_vm2 }
 0x109   : > { %v494_v4 = vmul.f32 %v934_v56, %v493_v48  ;;  %v523_v28 = vsub.f32 1.0, %v522_v7  ;;  %746 = vrcp.f32 %v941_v59  ;;  %vm527_vm6 = vweird.f32 %v741_v51 }
 0x10a   : > { %v480_v8 = vadd.f32 %v929_v54, %v479_v55  ;;  %v509_v26 = vmul.f32 %v947_v25, %v508_v5  ;;  %v538_v34 = vsub.f32 1.0, %v537_v15  ;;  %v552_v39 = vmul.f32 %v745_v31, %v926_v11  ;;  %vm528_vm7 = vmor %vm526_vm11, %vm527_vm6 }
 0x10b   : > { %v495_v24 = vadd.f32 %v934_v56, %v494_v4  ;;  %v524_v40 = vmul.f32 %v741_v51, %v523_v28  ;;  %v548_v53 = vor.u32 1.1754944e-38, %v547_v23  ;;  %v562_v12 = vand.u32 2147483648, %v926_v11 }
 0x10c   : > { %v484_v36 = vsel %vm990_vm3, %v929_v54, %v480_v8  ;;  %v510_v38 = vadd.f32 %v947_v25, %v509_v26  ;;  %v539_v46 = vmul.f32 %v743_v3, %v538_v34  ;;  %vm542_vm3 = vweird.f32 %v743_v3 }
 0x10d   : > { %v499_v42 = vsel %vm1006_vm5, %v934_v56, %v495_v24  ;;  %v525_v52 = vadd.f32 %v741_v51, %v524_v40  ;;  %v560_v54 = vand.u32 2147483647, %v926_v11  ;;  %v489_v41 = vsel %vm954_vm10, %v488_v57, %v484_v36  ;;  %vm543_vm8 = vmor %vm541_vm13, %vm542_vm3 }
 0x10e   : > { %v514_v10 = vsel %vm1016_vm9, %v947_v25, %v510_v38  ;;  %v540_v14 = vadd.f32 %v743_v3, %v539_v46  ;;  %v553_v56 = vsub.f32 1.0, %v552_v39  ;;  %v504_v13 = vsel %vm963_vm12, %v503_v62, %v499_v42 }
 0x10f   : > { %v529_v58 = vsel %vm528_vm7, %v741_v51, %v525_v52  ;;  %vm557_vm14 = vweird.f32 %v745_v31  ;;  %748 = vrcp.f32 %v949_v63  ;;  %v747_v61 = vpop.eup %746  ;;  %v519_v57 = vsel %vm971_vm15, %v518_v0, %v514_v10 }
 0x110   : > { %v534_v43 = vsel %vm977_vm0, %v533_v33, %v529_v58  ;;  %v544_v18 = vsel %vm543_vm8, %v743_v3, %v540_v14  ;;  %v554_v25 = vmul.f32 %v745_v31, %v553_v56  ;;  %v567_v62 = vmul.f32 %v747_v61, %v941_v59 }
 0x111   : > { %v549_v45 = vsel %vm994_vm4, %v548_v53, %v544_v18  ;;  %vm556_vm10 = vweird.f32 %v926_v11  ;;  %v596_v29 = vmul.f32 %v489_v41, %v887_v16  ;;  %v597_v47 = vmul.f32 %v504_v13, %v889_v17 }
 0x112   : > { %v555_v1 = vadd.f32 %v745_v31, %v554_v25  ;;  %vm558_vm11 = vmor %vm556_vm10, %vm557_vm14  ;;  %v563_v48 = vor.u32 1.1754944e-38, %v562_v12  ;;  %v568_v49 = vsub.f32 1.0, %v567_v62  ;;  %v598_v50 = vmul.f32 %v519_v57, %v891_v19 }
 0x113   : > { %v599_v51 = vmul.f32 %v534_v43, %v893_v20  ;;  %vm561_vm12 = vcmp.eq.f32.partialorder %v560_v54, 8.507059e+37  ;;  %v577_v60 = vand.u32 2147483648, %v941_v59  ;;  %v600_v11 = vmul.f32 %v549_v45, %v895_v21  ;;  %604 = vst.msk [vmem:[%s1044_s13] sm:$0xff] %vm301_vm1, %v596_v29 }
 0x114   : > { %v559_v55 = vsel %vm558_vm11, %v745_v31, %v555_v1  ;;  %v569_v0 = vmul.f32 %v747_v61, %v568_v49  ;;  %vm572_vm13 = vweird.f32 %v747_v61  ;;  %v575_v2 = vand.u32 2147483647, %v941_v59  ;;  %605 = vst.msk [vmem:[%s1044_s13 + $0x8] sm:$0xff] %vm301_vm1, %v597_v47 }
 0x115   : > { %v749_v16 = vpop.eup %748  ;;  %v564_v17 = vsel %vm561_vm12, %v563_v48, %v559_v55  ;;  %606 = vst.msk [vmem:[%s1044_s13 + $0x10] sm:$0xff] %vm301_vm1, %v598_v50  ;;  %vm571_vm15 = vweird.f32 %v941_v59  ;;  %v578_v21 = vor.u32 1.1754944e-38, %v577_v60  ;;  %v592_v6 = vand.u32 2147483648, %v949_v63 }
 0x116   : > { %v582_v19 = vmul.f32 %v749_v16, %v949_v63  ;;  %v601_v20 = vmul.f32 %v564_v17, %v897_v22  ;;  %v570_v3 = vadd.f32 %v747_v61, %v569_v0  ;;  %607 = vst.msk [vmem:[%s1044_s13 + $0x18] sm:$0xff] %vm301_vm1, %v599_v51  ;;  %vm573_vm0 = vmor %vm571_vm15, %vm572_vm13  ;;  %vm576_vm2 = vcmp.eq.f32.partialorder %v575_v2, 8.507059e+37 }
 0x117   : > { %608 = vst.msk [vmem:[%s1044_s13 + $0x20] sm:$0xff] %vm301_vm1, %v600_v11  ;;  %vm587_vm4 = vweird.f32 %v749_v16  ;;  %v590_v59 = vand.u32 2147483647, %v949_v63  ;;  %vm586_vm5 = vweird.f32 %v949_v63  ;;  %v593_v15 = vor.u32 1.1754944e-38, %v592_v6 }
 0x118   : > { %v583_v4 = vsub.f32 1.0, %v582_v19  ;;  %v574_v5 = vsel %vm573_vm0, %v747_v61, %v570_v3  ;;  %609 = vst.msk [vmem:[%s1044_s13 + $0x28] sm:$0xff] %vm301_vm1, %v601_v20  ;;  %vm588_vm6 = vmor %vm586_vm5, %vm587_vm4 }
 0x119   : > { %v579_v22 = vsel %vm576_vm2, %v578_v21, %v574_v5  ;;  %vm591_vm9 = vcmp.eq.f32.partialorder %v590_v59, 8.507059e+37 }
 0x11a   : > { %v584_v7 = vmul.f32 %v749_v16, %v583_v4  ;;  %v602_v8 = vmul.f32 %v579_v22, %v902_v27 }
 0x11c   : > { %v585_v9 = vadd.f32 %v749_v16, %v584_v7  ;;  %610 = vst.msk [vmem:[%s1044_s13 + $0x30] sm:$0xff] %vm301_vm1, %v602_v8 }
 0x11e   : > { %v589_v23 = vsel %vm588_vm6, %v749_v16, %v585_v9 }
 0x11f   : > { %v594_v24 = vsel %vm591_vm9, %v593_v15, %v589_v23 }
 0x120   : > { %v603_v26 = vmul.f32 %v594_v24, %v905_v30 }
 0x122   : > { %611 = vst.msk [vmem:[%s1044_s13 + $0x38] sm:$0xff] %vm301_vm1, %v603_v26 }
 0x123 PF: > { %s15_s18 = sadd.s32 1, %s756_s18  }
 0x124   : > { %p12_p4 = scmp.ge.s32.totalorder %s15_s18, 4  }
 0x126   :  { %14 = sbr.rel (!%p12_p4) target bundleno = 1 (0x1), region = 70 }

</bundles_post_ra>
